<compile_context>
chip_gen: v5e
topology: v5e:2x2
jax: 0.10.0
libtpu: 0.0.40
codegen_flags: <defaults>
</compile_context>

<pallas_src>
import math

import jax
import jax.numpy as jnp
from jax.experimental import pallas as pl
from jax.experimental.pallas import tpu as pltpu


def _round_up(x: int, m: int) -> int:
    return ((x + m - 1) // m) * m


def _encoder_kernel(x_ref, w_ref, b_ref, o_ref, acc_ref):
    """One (key n, reduction-tile k) grid step.

    x_ref  : (1, B_pad, tk)     bf16
    w_ref  : (1, tk, C_pad)     bf16
    b_ref  : (1, 1, C_pad)      f32
    o_ref  : (1, B_pad, C_pad)  f32   (resident across the k axis)
    acc_ref: (B_pad, C_pad)     f32 VMEM scratch accumulator
    """
    k = pl.program_id(1)

    @pl.when(k == 0)
    def _init():
        # Fold the bias into the accumulator init (single broadcast per key).
        acc_ref[...] = jnp.broadcast_to(b_ref[0], acc_ref.shape)

    acc_ref[...] += jnp.dot(
        x_ref[0], w_ref[0], preferred_element_type=jnp.float32
    )

    @pl.when(k == pl.num_programs(1) - 1)
    def _finalize():
        o_ref[0] = acc_ref[...].astype(o_ref.dtype)


def fused_encode(x_all, w_all, b_all, *, tk):
    """x_all [N,B_pad,D_pad] bf16 @ w_all [N,D_pad,C_pad] bf16 + b_all -> f32."""
    n_keys, b_pad, d_pad = x_all.shape
    c_pad = w_all.shape[-1]
    k_tiles = d_pad // tk

    cost = pl.CostEstimate(
        flops=2 * n_keys * b_pad * d_pad * c_pad,
        transcendentals=0,
        bytes_accessed=(x_all.size * x_all.dtype.itemsize
                        + w_all.size * w_all.dtype.itemsize
                        + b_all.size * b_all.dtype.itemsize
                        + n_keys * b_pad * c_pad * 4),
    )

    return pl.pallas_call(
        _encoder_kernel,
        out_shape=jax.ShapeDtypeStruct((n_keys, b_pad, c_pad), jnp.float32),
        grid_spec=pltpu.PrefetchScalarGridSpec(
            num_scalar_prefetch=0,
            grid=(n_keys, k_tiles),
            in_specs=[
                pl.BlockSpec((1, b_pad, tk), lambda n, k: (n, 0, k)),
                pl.BlockSpec((1, tk, c_pad), lambda n, k: (n, k, 0)),
                pl.BlockSpec((1, 1, c_pad), lambda n, k: (n, 0, 0)),
            ],
            out_specs=pl.BlockSpec((1, b_pad, c_pad), lambda n, k: (n, 0, 0)),
            scratch_shapes=[pltpu.VMEM((b_pad, c_pad), jnp.float32)],
        ),
        compiler_params=pltpu.CompilerParams(
            dimension_semantics=("parallel", "arbitrary"),
        ),
        cost_estimate=cost,
    )(x_all, w_all, b_all)


class ObservationEncoder:
    """JAX/Pallas port of the (abstract) PyTorch ObservationEncoder."""

    def __init__(self, num_embedding_channels: int, obs_specs, key,
                 *, reduction_tile: int = 512):
        # obs_specs: dict name -> per-example shape (excluding batch dim)
        self.num_embedding_channels = num_embedding_channels
        self._names = sorted(obs_specs.keys())
        self._flat_dims = {n: int(math.prod(obs_specs[n])) for n in self._names}

        d_max = max(self._flat_dims.values())
        if d_max >= reduction_tile:
            self._tk = reduction_tile                 # multiple of 128
        else:
            self._tk = _round_up(d_max, 128)
        self._d_pad = _round_up(d_max, self._tk)
        self._c_pad = _round_up(num_embedding_channels, 128)

        # Deterministic parameter init (synthetic; no checkpoint load).
        # Weights stored zero-padded + bf16 (f32 accumulation in the MXU),
        # biases zero-padded + f32, pre-stacked into a single slab per tensor
        # so one fused pallas_call covers every observation key.
        ws, bs = [], []
        for idx, name in enumerate(self._names):
            d = self._flat_dims[name]
            wkey, bkey = jax.random.split(jax.random.fold_in(key, idx))
            w = jax.random.normal(wkey, (d, num_embedding_channels),
                                  dtype=jnp.float32) * (1.0 / jnp.sqrt(d))
            b = jax.random.normal(bkey, (1, num_embedding_channels),
                                  dtype=jnp.float32) * 0.01
            w = jnp.pad(w, ((0, self._d_pad - d),
                            (0, self._c_pad - num_embedding_channels)))
            b = jnp.pad(b, ((0, 0),
                            (0, self._c_pad - num_embedding_channels)))
            ws.append(w.astype(jnp.bfloat16))
            bs.append(b)
        self.w_all = jnp.stack(ws, axis=0)   # [N, D_pad, C_pad] bf16
        self.b_all = jnp.stack(bs, axis=0)   # [N, 1, C_pad]     f32

        self._jit_forward = jax.jit(self._forward)

    def _forward(self, w_all, b_all, observation):
        B = observation[self._names[0]].shape[0]
        b_pad = _round_up(B, 8)
        xs = []
        for name in self._names:
            x = observation[name].reshape(B, -1).astype(jnp.bfloat16)
            xs.append(jnp.pad(x, ((0, b_pad - B),
                                  (0, self._d_pad - x.shape[1]))))
        x_all = jnp.stack(xs, axis=0)        # [N, B_pad, D_pad] bf16

        out = fused_encode(x_all, w_all, b_all, tk=self._tk)
        # [N, B_pad, C_pad] -> [B, num_keys, C]
        return jnp.transpose(out[:, :B, :self.num_embedding_channels],
                             (1, 0, 2))

    def __call__(self, observation):
        return self._jit_forward(self.w_all, self.b_all, observation)


if __name__ == "__main__":
    key = jax.random.PRNGKey(0)
    k_img, k_state, k_params = jax.random.split(key, 3)

    batch = 2
    num_embedding_channels = 32

    # Observation dict: an NCHW image-like tensor and a flat state vector.
    observation = {
        "image": jax.random.normal(k_img, (batch, 4, 16, 16), dtype=jnp.float32),
        "state": jax.random.normal(k_state, (batch, 8), dtype=jnp.float32),
    }
    obs_specs = {name: tuple(v.shape[1:]) for name, v in observation.items()}

    encoder = ObservationEncoder(num_embedding_channels, obs_specs, k_params)
    out = encoder(observation)
    out = jax.block_until_ready(out)

    # Pure-JAX reference at matching operand precision (bf16 operands,
    # f32 accumulation).
    names = sorted(observation.keys())
    refs = []
    for n, name in enumerate(names):
        d = int(math.prod(observation[name].shape[1:]))
        x32 = observation[name].reshape(batch, -1).astype(
            jnp.bfloat16).astype(jnp.float32)
        w32 = encoder.w_all[n, :d, :num_embedding_channels].astype(jnp.float32)
        b32 = encoder.b_all[n, 0, :num_embedding_channels]
        refs.append(
            jnp.dot(x32, w32, precision=jax.lax.Precision.HIGHEST) + b32)
    ref = jnp.stack(refs, axis=1)

    assert out.shape == (batch, len(observation), num_embedding_channels), out.shape
    assert out.dtype == jnp.float32, out.dtype
    assert jnp.allclose(out, ref, atol=1e-3, rtol=1e-3), float(
        jnp.max(jnp.abs(out - ref)))

    print("KERNEL_OK")
</pallas_src>

<mosaic_0001>
module attributes {stable_mosaic.version = 11 : i64} {
  func.func @_encoder_kernel(%arg0: i32, %arg1: i32, %arg2: memref<1x8x512xbf16, #tpu.memory_space<vmem>>, %arg3: memref<1x512x128xbf16, #tpu.memory_space<vmem>>, %arg4: memref<1x1x128xf32, #tpu.memory_space<vmem>>, %arg5: memref<1x8x128xf32, #tpu.memory_space<vmem>>, %arg6: memref<8x128xf32, #tpu.memory_space<vmem>>) attributes {dimension_semantics = [#tpu.dimension_semantics<parallel>, #tpu.dimension_semantics<arbitrary>], iteration_bounds = array<i64: 2, 2>, scalar_prefetch = 0 : i64, scratch_operands = 1 : i64, tpu.core_type = #tpu.core_type<tc>, window_params = [{transform_indices = @transform_0, window_bounds = array<i64: 1, 8, 512>}, {transform_indices = @transform_1, window_bounds = array<i64: 1, 512, 128>}, {transform_indices = @transform_2, window_bounds = array<i64: 1, 1, 128>}, {transform_indices = @transform_3, window_bounds = array<i64: 1, 8, 128>}]} {
    %c0_i32 = arith.constant 0 : i32
    %0 = arith.cmpi eq, %arg1, %c0_i32 : i32
    %1 = arith.extui %0 : i1 to i32
    %c0_i32_0 = arith.constant 0 : i32
    %2 = arith.cmpi ne, %1, %c0_i32_0 : i32
    scf.if %2 {
      %c0_11 = arith.constant 0 : index
      %c0_12 = arith.constant 0 : index
      %c0_13 = arith.constant 0 : index
      %14 = vector.load %arg4[%c0_11, %c0_12, %c0_13] : memref<1x1x128xf32, #tpu.memory_space<vmem>>, vector<1x1x128xf32>
      %15 = vector.shape_cast %14 : vector<1x1x128xf32> to vector<1x128xf32>
      %16 = vector.shape_cast %15 : vector<1x128xf32> to vector<1x128xf32>
      %17 = vector.broadcast %16 : vector<1x128xf32> to vector<8x128xf32>
      %c0_14 = arith.constant 0 : index
      %c0_15 = arith.constant 0 : index
      %18 = vector.load %arg6[%c0_14, %c0_15] : memref<8x128xf32, #tpu.memory_space<vmem>>, vector<8x128xf32>
      tpu.vector_store %arg6[%c0_14, %c0_15], %17 {strides = array<i32>} : memref<8x128xf32, #tpu.memory_space<vmem>>, vector<8x128xf32>,
    } else {
    }
    %c0 = arith.constant 0 : index
    %c0_1 = arith.constant 0 : index
    %3 = vector.load %arg6[%c0, %c0_1] : memref<8x128xf32, #tpu.memory_space<vmem>>, vector<8x128xf32>
    %c0_2 = arith.constant 0 : index
    %c0_3 = arith.constant 0 : index
    %c0_4 = arith.constant 0 : index
    %4 = vector.load %arg2[%c0_2, %c0_3, %c0_4] : memref<1x8x512xbf16, #tpu.memory_space<vmem>>, vector<1x8x512xbf16>
    %5 = vector.shape_cast %4 : vector<1x8x512xbf16> to vector<8x512xbf16>
    %c0_5 = arith.constant 0 : index
    %c0_6 = arith.constant 0 : index
    %c0_7 = arith.constant 0 : index
    %6 = vector.load %arg3[%c0_5, %c0_6, %c0_7] : memref<1x512x128xbf16, #tpu.memory_space<vmem>>, vector<1x512x128xbf16>
    %7 = vector.shape_cast %6 : vector<1x512x128xbf16> to vector<512x128xbf16>
    %cst = arith.constant dense<0.000000e+00> : vector<8x128xf32>
    %8 = tpu.matmul %5, %7, %cst {dimension_numbers = #tpu.dot_dimension_numbers<[1], [0], [0], [1], [0, 0, 1, 1], [], []>} : vector<8x512xbf16>, vector<512x128xbf16>, vector<8x128xf32> -> vector<8x128xf32>
    %9 = arith.addf %3, %8 : vector<8x128xf32>
    %c0_8 = arith.constant 0 : index
    %c0_9 = arith.constant 0 : index
    %10 = vector.load %arg6[%c0_8, %c0_9] : memref<8x128xf32, #tpu.memory_space<vmem>>, vector<8x128xf32>
    tpu.vector_store %arg6[%c0_8, %c0_9], %9 {strides = array<i32>} : memref<8x128xf32, #tpu.memory_space<vmem>>, vector<8x128xf32>,
    %c1_i32 = arith.constant 1 : i32
    %11 = arith.cmpi eq, %arg1, %c1_i32 : i32
    %12 = arith.extui %11 : i1 to i32
    %c0_i32_10 = arith.constant 0 : i32
    %13 = arith.cmpi ne, %12, %c0_i32_10 : i32
    scf.if %13 {
      %c0_11 = arith.constant 0 : index
      %c0_12 = arith.constant 0 : index
      %14 = vector.load %arg6[%c0_11, %c0_12] : memref<8x128xf32, #tpu.memory_space<vmem>>, vector<8x128xf32>
      %c0_13 = arith.constant 0 : index
      %c0_14 = arith.constant 0 : index
      %c0_15 = arith.constant 0 : index
      %15 = vector.load %arg5[%c0_13, %c0_14, %c0_15] : memref<1x8x128xf32, #tpu.memory_space<vmem>>, vector<1x8x128xf32>
      %16 = vector.shape_cast %15 : vector<1x8x128xf32> to vector<8x128xf32>
      %17 = vector.shape_cast %14 : vector<8x128xf32> to vector<1x8x128xf32>
      tpu.vector_store %arg5[%c0_13, %c0_14, %c0_15], %17 {strides = array<i32>} : memref<1x8x128xf32, #tpu.memory_space<vmem>>, vector<1x8x128xf32>,
    } else {
    }
    return
  }
  func.func @transform_0(%arg0: i32, %arg1: i32) -> (i32, i32, i32) {
    %c0_i32 = arith.constant 0 : i32
    %c0_i32_0 = arith.constant 0 : i32
    return %arg0, %c0_i32, %arg1 : i32, i32, i32
  }
  func.func @transform_1(%arg0: i32, %arg1: i32) -> (i32, i32, i32) {
    %c0_i32 = arith.constant 0 : i32
    %c0_i32_0 = arith.constant 0 : i32
    return %arg0, %arg1, %c0_i32 : i32, i32, i32
  }
  func.func @transform_2(%arg0: i32, %arg1: i32) -> (i32, i32, i32) {
    %c0_i32 = arith.constant 0 : i32
    %c0_i32_0 = arith.constant 0 : i32
    %c0_i32_1 = arith.constant 0 : i32
    return %arg0, %c0_i32, %c0_i32_0 : i32, i32, i32
  }
  func.func @transform_3(%arg0: i32, %arg1: i32) -> (i32, i32, i32) {
    %c0_i32 = arith.constant 0 : i32
    %c0_i32_0 = arith.constant 0 : i32
    %c0_i32_1 = arith.constant 0 : i32
    return %arg0, %c0_i32, %c0_i32_0 : i32, i32, i32
  }
}

</mosaic_0001>

<bundles_post_ra>
// kernel: _forward.1
= control target key start
LH: loop header
LB: loop body
LE: loop exit
PB: predicated region body
PF: predicated region fallthrough
CT: control target
= control target key end

     0   :  { %8 = vsyncpa [#allocation4], 0  ;;  %s1241_s0 = inlined_call_operand.vmem [shape: bf16[2,8,1024], index: 0, kind: input, shape index: {}]   ;;  %s1242_s1 = inlined_call_operand.hbm [shape: bf16[2,1024,128], index: 1, kind: input, shape index: {}]   ;;  %s1243_s2 = inlined_call_operand.vmem [shape: f32[2,1,128], index: 2, kind: input, shape index: {}]   ;;  %s1244_s3 = inlined_call_operand.vmem [shape: f32[2,8,128], index: 3, kind: output, shape index: {}]  }
   0x1   :  { %10 = vsyncpa [#allocation4 + $0x1], 0  ;;  %s1078_s12 = smov 0   ;;  %s1080_s13 = smov 0  }
   0x2   :  { %s1082_s14 = smov 0   ;;  %s1084_s15 = smov 0  }
   0x3   :  { %s1086_s16 = smov 0   ;;  %s1088_s17 = smov 0  }
   0x4   :  { %s1090_s18 = smov 0   ;;  %s1092_s19 = smov 0  }
   0x5 LB: > { %s706_s20 = sadd.s32 4294967295, %s1054_s19   ;;  %s25_s21 = sadd.s32 1, %s1046_s17  ;;  %s1054_s19 = sphi %s1092_s19, %s16_s19   ;;  %s1050_s18 = sphi %s1090_s18, %s1253_s18   ;;  %s1046_s17 = sphi %s1088_s17, %s1252_s17   ;;  %s1042_s16 = sphi %s1086_s16, %s1251_s16   ;;  %s1038_s15 = sphi %s1084_s15, %s1250_s15   ;;  %s1034_s14 = sphi %s1082_s14, %s1249_s14   ;;  %s1030_s13 = sphi %s1080_s13, %s1248_s13   ;;  %s1026_s12 = sphi %s1078_s12, %s1247_s12  }
   0x6   : > { %p26_p0 = scmp.ge.s32.totalorder %s25_s21, 2  ;;  %s28_s22 = sadd.s32 1, %s1050_s18 }
   0x7   : > { %s65_s23 = sadd.s32 1, %s1034_s14  ;;  %p72_p1 = scmp.ne.s32.totalorder %s1034_s14, %s1030_s13 }
   0x8   : > { %s1255_s21 = smov (%p26_p0, %s25_s21), 0  ;;  %s1257_s22 = smov (!%p26_p0, %s28_s22), %s1050_s18 }
   0x9   : > { %s61_s24 = ssub.s32 %s1046_s17, %s1255_s21  ;;  %p73_p2 = scmp.eq.s32.totalorder %s1054_s19, 0 }
   0xa   : > { %p30_p3 = scmp.ge.s32.totalorder %s1257_s22, 2  ;;  %p78_p4 = scmp.ne.s32.totalorder %s1030_s13, %s1026_s12 }
   0xb   : > { %p1129_p5 = por %p73_p2, %p72_p1  ;;  %p79_p6 = scmp.eq.s32.totalorder %s706_s20, 0 }
   0xc   : > { %s1259_s22 = smov (%p30_p3, %s1257_s22), 0  ;;  %p890_p8 = scmp.lt.s32.totalorder %s1054_s19, 4 }
   0xd   : > { %p1135_p7 = por %p79_p6, %p78_p4  ;;  %s60_s27 = ssub.s32 %s1050_s18, %s1259_s22 }
   0xe   : > { %s62_s28 = sor.u32 %s61_s24, %s60_s27  ;;  %s167_s29 = sand.u32 1, %s1034_s14  }
   0xf   : > { %p63_p9 = scmp.eq.s32.totalorder %s62_s28, 0  ;;  %s710_s30 = sshll.u32 %s167_s29, 8 }
  0x10   : > { %s711_s4 = sshll.u32 %s1046_s17, 6  ;;  %s712_s6 = sshll.u32 %s1050_s18, 7 }
  0x11   : > { %s1145_s5 = scalar_select %p63_p9, %s1034_s14, %s65_s23  }
  0x12   : > { %s176_s7 = sadd.s32 %s712_s6, %s711_s4  ;;  %s171_s8 = scalar_lea.vmem [#allocation3], %s710_s30 }
  0x13   : > { %s181_s9 = sshll.u32 %s171_s8, 4  ;;  %s713_s10 = sshll.u32 %s176_s7, 2  ;;  %s182_s9 = int_to_ptr.vmem [resolvable:$true] %s181_s9 }
  0x14   : > { %s178_s20 = scalar_lea.hbm %s1242_s1, %s713_s10  ;;  %p887_p10 = pnand %p890_p8, %p1129_p5 }
  0x15   : > { %s179_s24 = sshll.u32 %s178_s20, 4  ;;  %p714_p11 = scmp.ge.s32.totalorder %s1054_s19, 1  ;;  %s180_s24 = int_to_ptr.hbm [resolvable:$true] %s179_s24 }
  0x16   : > { %s168_s27 = scalar_lea.sflag [#allocation4], %s167_s29  ;;  %s1056_s23 = smov 64  }
  0x17   : > { %s1057_s28 = smov 4   ;;  %p195_p12 = scmp.lt.s32.totalorder %s1054_s19, 5 }
  0x18   : > { %889 = dma.hbm_to_vmem [thread:$0]  (!%p887_p10), %s180_s24, 4096, %s182_s9, %s168_s27, %s1056_s23, %s1056_s23, %s1057_s28  }
  0x19   : > { %p196_p13 = pnand %p714_p11, %p195_p12 }
  0x1a   : > { %s201_s30 = sand.u32 (!%p196_p13), 1, %s1030_s13  }
  0x1b   : > { %199 = sbr.rel (%p196_p13) target bundleno = 227 (0xe3), region = 32  ;;  %s715_s4 = sshll.u32 (!%p196_p13), %s201_s30, 8 }
  0x1c   : > { %s202_s6 = scalar_lea.sflag (!%p196_p13), [#allocation4], %s201_s30  ;;  %s1158_s7 = scalar_lea.vmem (!%p196_p13), [#allocation3], %s715_s4 }
  0x20   : > { %1021 = dma.done.wait (%p1135_p7), %s202_s6, 4096  }
  0x21   : > { %1023 = vsyncadd (%p1135_p7), %s202_s6, 4294963200  ;;  %s716_s25 = sshll.u32 %s1038_s15, 2  ;;  %p241_p0 = scmp.lt.s32.totalorder %s1042_s16, 1 }
  0x22   : > { %p243_p1 = scmp.lt.s32.totalorder %s716_s25, 7  ;;  %p720_p2 = scmp.ne.s32.totalorder %s1038_s15, 0 }
  0x23   : > { %s1261_s16 = smov (!%p241_p0, %s1042_s16), 1 }
  0x24   : > { %s1263_s25 = smov (!%p243_p1, %s716_s25), 7  ;;  %s717_s29 = sshll.u32 %s1261_s16, 3 }
  0x25   : > { %s253_s10 = scalar_lea.vmem %s1243_s2, %s1261_s16  ;;  %s246_s11 = sadd.s32 %s717_s29, %s1263_s25 }
  0x26   : > { %s1173_s24 = scalar_lea.vmem %s1244_s3, %s717_s29  ;;  %s718_s26 = sshll.u32 %s246_s11, 2 }
  0x27   : > { %s1178_s28 = scalar_lea.vmem %s1241_s0, %s718_s26  ;;  %261 = sbr.rel (%p720_p2) target bundleno = 46 (0x2e), region = 40 }
  0x2c   : > { %v957_v0 = vld [vmem:[%s253_s10] ss:$0 sm:$0xff] }
  0x2d   : > { %266 = vst [vmem:[#allocation2] sm:$0xff] %v957_v0 }
  0x2e PF: > { %v859_v1 = vld [vmem:[%s1158_s7 + $0x38] sm:$0xff]  ;;  %v858_v5 = vld [vmem:[%s1158_s7 + $0x30] sm:$0xff]  ;;  %v857_v9 = vld [vmem:[%s1158_s7 + $0x28] sm:$0xff]  ;;  %p849_p3 = scmp.ne.s32.totalorder %s1038_s15, 1 }
  0x2f   : > { %v867_v2 = vld [vmem:[%s1158_s7 + $0x78] sm:$0xff]  ;;  %540 = vmatpush.bf16.msra.mxu0 %v859_v1  ;;  %v866_v6 = vld [vmem:[%s1158_s7 + $0x70] sm:$0xff]  ;;  %v865_v10 = vld [vmem:[%s1158_s7 + $0x68] sm:$0xff] }
  0x30   : > { %v875_v3 = vld [vmem:[%s1158_s7 + $0xb8] sm:$0xff]  ;;  %553 = vmatpush.bf16.msra.mxu1 %v867_v2  ;;  %v874_v7 = vld [vmem:[%s1158_s7 + $0xb0] sm:$0xff]  ;;  %v873_v11 = vld [vmem:[%s1158_s7 + $0xa8] sm:$0xff] }
  0x31   : > { %v883_v4 = vld [vmem:[%s1158_s7 + $0xf8] sm:$0xff]  ;;  %566 = vmatpush.bf16.msra.mxu2 %v875_v3  ;;  %v882_v8 = vld [vmem:[%s1158_s7 + $0xf0] sm:$0xff]  ;;  %v881_v12 = vld [vmem:[%s1158_s7 + $0xe8] sm:$0xff] }
  0x32   : > { %579 = vmatpush.bf16.msra.mxu3 %v883_v4  ;;  %v856_v13 = vld [vmem:[%s1158_s7 + $0x20] sm:$0xff]  ;;  %v855_v17 = vld [vmem:[%s1158_s7 + $0x18] sm:$0xff]  ;;  %v854_v21 = vld [vmem:[%s1158_s7 + $0x10] sm:$0xff] }
  0x33   : > { %541 = vmatpush.bf16.msra.mxu0 %v858_v5  ;;  %v864_v14 = vld [vmem:[%s1158_s7 + $0x60] sm:$0xff]  ;;  %v863_v18 = vld [vmem:[%s1158_s7 + $0x58] sm:$0xff]  ;;  %v862_v22 = vld [vmem:[%s1158_s7 + $0x50] sm:$0xff] }
  0x34   : > { %554 = vmatpush.bf16.msra.mxu1 %v866_v6  ;;  %v872_v15 = vld [vmem:[%s1158_s7 + $0xa0] sm:$0xff]  ;;  %v871_v19 = vld [vmem:[%s1158_s7 + $0x98] sm:$0xff]  ;;  %v870_v23 = vld [vmem:[%s1158_s7 + $0x90] sm:$0xff] }
  0x35   : > { %567 = vmatpush.bf16.msra.mxu2 %v874_v7  ;;  %v880_v16 = vld [vmem:[%s1158_s7 + $0xe0] sm:$0xff]  ;;  %v879_v20 = vld [vmem:[%s1158_s7 + $0xd8] sm:$0xff]  ;;  %v878_v24 = vld [vmem:[%s1158_s7 + $0xd0] sm:$0xff] }
  0x36   : > { %580 = vmatpush.bf16.msra.mxu3 %v882_v8  ;;  %v853_v25 = vld [vmem:[%s1158_s7 + $0x8] sm:$0xff]  ;;  %v268_v27 = vld [vmem:[%s1178_s28] sm:$0xff]  ;;  %v269_v30 = vld [vmem:[%s1178_s28 + $0x8] sm:$0xff] }
  0x37   : > { %542 = vmatpush.bf16.msra.mxu0 %v857_v9  ;;  %v861_v26 = vld [vmem:[%s1158_s7 + $0x48] sm:$0xff]  ;;  %v336_v31 = vunpack.c.l.b16 %v268_v27  ;;  %v337_v32 = vunpack.c.h.b16 %v268_v27  ;;  %v852_v33 = vld [vmem:[%s1158_s7] sm:$0xff]  ;;  %v338_v35 = vunpack.c.l.b16 %v269_v30  ;;  %v339_v36 = vunpack.c.h.b16 %v269_v30  ;;  %v267_v51 = vld [vmem:[#allocation2] sm:$0xff] }
  0x38   : > { %555 = vmatpush.bf16.msra.mxu1 %v865_v10  ;;  %v869_v28 = vld [vmem:[%s1158_s7 + $0x88] sm:$0xff]  ;;  %v860_v34 = vld [vmem:[%s1158_s7 + $0x40] sm:$0xff] }
  0x39   : > { %568 = vmatpush.bf16.msra.mxu2 %v873_v11  ;;  %v877_v29 = vld [vmem:[%s1158_s7 + $0xc8] sm:$0xff]  ;;  %v868_v37 = vld [vmem:[%s1158_s7 + $0x80] sm:$0xff]  ;;  %v340_v39 = vpack.c.b16 %v336_v31, %v336_v31  ;;  %v341_v40 = vpack.c.b16 %v337_v32, %v337_v32  ;;  %v342_v41 = vpack.c.b16 %v338_v35, %v338_v35  ;;  %v343_v42 = vpack.c.b16 %v339_v36, %v339_v36 }
  0x3a   : > { %581 = vmatpush.bf16.msra.mxu3 %v881_v12  ;;  %v876_v38 = vld [vmem:[%s1158_s7 + $0xc0] sm:$0xff] }
  0x3b   : > { %543 = vmatpush.bf16.msra.mxu0 %v856_v13 }
  0x3c   : > { %556 = vmatpush.bf16.msra.mxu1 %v864_v14 }
  0x3d   : > { %569 = vmatpush.bf16.msra.mxu2 %v872_v15 }
  0x3e   : > { %582 = vmatpush.bf16.msra.mxu3 %v880_v16 }
  0x3f   : > { %544 = vmatpush.bf16.msra.mxu0 %v855_v17 }
  0x40   : > { %557 = vmatpush.bf16.msra.mxu1 %v863_v18 }
  0x41   : > { %570 = vmatpush.bf16.msra.mxu2 %v871_v19 }
  0x42   : > { %583 = vmatpush.bf16.msra.mxu3 %v879_v20 }
  0x43   : > { %545 = vmatpush.bf16.msra.mxu0 %v854_v21 }
  0x44   : > { %558 = vmatpush.bf16.msra.mxu1 %v862_v22 }
  0x45   : > { %571 = vmatpush.bf16.msra.mxu2 %v870_v23 }
  0x46   : > { %584 = vmatpush.bf16.msra.mxu3 %v878_v24 }
  0x47   : > { %546 = vmatpush.bf16.msra.mxu0 %v853_v25 }
  0x48   : > { %559 = vmatpush.bf16.msra.mxu1 %v861_v26 }
  0x49   : > { %572 = vmatpush.bf16.msra.mxu2 %v869_v28 }
  0x4a   : > { %585 = vmatpush.bf16.msra.mxu3 %v877_v29 }
  0x4b   : > { %547 = vmatpush.bf16.msra.mxu0 %v852_v33 }
  0x4c   : > { %560 = vmatpush.bf16.msra.mxu1 %v860_v34 }
  0x4d   : > { %573 = vmatpush.bf16.msra.mxu2 %v868_v37 }
  0x4e   : > { %586 = vmatpush.bf16.msra.mxu3 %v876_v38  ;;  %548 = vmatmul.bf16.vlgmr.msra.gmra.mxu0 %v340_v39 }
  0x4f   : > { %561 = vmatmul.bf16.vlgmr.msra.gmra.mxu1 %v341_v40 }
  0x50   : > { %574 = vmatmul.bf16.vlgmr.msra.gmra.mxu2 %v342_v41 }
  0x51   : > { %587 = vmatmul.bf16.vlgmr.msra.gmra.mxu3 %v343_v42 }
  0xcb   : > { %v549_v43 = vpop.f32.mrf.mxu0 }
  0xcc   : > { %v562_v44 = vpop.f32.mrf.mxu1 }
  0xcd   : > { %v563_v45 = vadd.f32 %v562_v44, %v549_v43 }
  0xd3   : > { %v575_v46 = vpop.f32.mrf.mxu2  ;;  %v551_v49 = vpop.f32.mrf.mxu0 }
  0xd4   : > { %v588_v47 = vpop.f32.mrf.mxu3  ;;  %v576_v48 = vadd.f32 %v575_v46, %v563_v45  ;;  %v564_v50 = vpop.f32.mrf.mxu1 }
  0xd6   : > { %v589_v52 = vadd.f32 %v588_v47, %v576_v48 }
  0xd8   : > { %v592_v53 = vadd.f32 %v589_v52, %v267_v51  ;;  %597 = sbr.rel (%p849_p3) target bundleno = 227 (0xe3), region = 44 }
  0xda   : > { %593 = vst [vmem:[#allocation2] sm:$0xff] %v592_v53 }
  0xdb   : > { %v577_v54 = vpop.f32.mrf.mxu2 }
  0xdc   : > { %v590_v55 = vpop.f32.mrf.mxu3 }
  0xe1   : > { %v598_v56 = vld [vmem:[#allocation2] sm:$0xff] }
  0xe2   : > { %599 = vst [vmem:[%s1173_s24] sm:$0xff] %v598_v56 }
  0xe3 PF: > { %s16_s19 = sadd.s32 1, %s1054_s19   ;;  %s1247_s12 = smov %s1030_s13 }
  0xe4   : > { %p13_p4 = scmp.ge.s32.totalorder %s16_s19, 6   ;;  %s1248_s13 = smov %s1034_s14 }
  0xe5   : > { %s1249_s14 = smov %s1145_s5  ;;  %s1250_s15 = smov %s1046_s17 }
  0xe6   : > { %s1251_s16 = smov %s1050_s18  ;;  %s1252_s17 = smov %s1255_s21 }
  0xe7   : > { %s1253_s18 = smov %s1259_s22  ;;  %15 = sbr.rel (!%p13_p4) target bundleno = 5 (0x5), region = 86 }
  0xec   :  { %619 = vsyncpa [#allocation4], 1 }
  0xed   :  { %621 = vsyncpa [#allocation4 + $0x1], 1 }

</bundles_post_ra>
